<compile_context>
chip_gen: v7x
topology: tpu7x:2x2x1
jax: 0.10.0
libtpu: 0.0.40
codegen_flags: <defaults>
</compile_context>

<pallas_src>
import functools
import math

import jax
import jax.numpy as jnp
from jax import lax
from jax.experimental import pallas as pl
from jax.experimental.pallas import tpu as pltpu


def _round_up(x, m):
    return ((x + m - 1) // m) * m


def _vmem_capacity_bytes():
    """Physical VMEM per TensorCore (64 MiB on v7x, 128 MiB on v5e/v6e)."""
    try:
        cap = getattr(pltpu.get_tpu_info(), "vmem_capacity_bytes", None)
        if cap:
            return int(cap)
    except Exception:
        pass
    return 64 * 1024 * 1024  # conservative: v7x per-TensorCore


def _pick_tm(n, max_tm):
    """Tokens per grid step: multiple of 8, <= max_tm, dividing n when possible."""
    max_tm = max(8, (max_tm // 8) * 8)
    if n <= max_tm:
        return _round_up(max(n, 1), 8)
    if n % 8 == 0:
        # Largest multiple-of-8 divisor of n that fits -> no token padding and
        # therefore no post-kernel slice copy of the whole output.
        for cand in range(max_tm, 7, -8):
            if n % cand == 0:
                return cand
    return max_tm


# ---------------------------------------------------------------------------
# Kernels.  The table passed in is already pre-scaled by sqrt(d_model).
# ---------------------------------------------------------------------------

def _onehot_gather_kernel(ids_ref, table_ref, out_ref, *, vocab):
    """VMEM-resident table; gather = one-hot matmul on the MXU (small vocab)."""
    ids = ids_ref[...]                                      # (tm, 1) int32, VMEM
    tm = ids.shape[0]
    iota = lax.broadcasted_iota(jnp.int32, (tm, vocab), 1)
    one_hot = (ids == iota).astype(table_ref.dtype)         # exactly one 1 per row
    out_ref[...] = jnp.dot(
        one_hot, table_ref[...],
        preferred_element_type=jnp.float32).astype(out_ref.dtype)


def _rowcopy_gather_kernel(ids_ref, table_ref, out_ref, *, tm):
    """VMEM-resident table; gather = scalar-indexed row copies (large vocab)."""
    def body(t, carry):
        idx = ids_ref[0, t]                                  # SMEM scalar read
        out_ref[pl.ds(t, 1), :] = table_ref[pl.ds(idx, 1), :]
        return carry

    lax.fori_loop(0, tm, body, 0, unroll=8)


def _hbm_gather_kernel(ids_ref, table_hbm, out_ref, sems, *, tm, k_inflight):
    """Table stays in HBM; row DMAs land straight in the output block."""

    def _issue(t):
        idx = ids_ref[0, t]
        pltpu.make_async_copy(
            table_hbm.at[pl.ds(idx, 1), :],
            out_ref.at[pl.ds(t, 1), :],
            sems.at[t % k_inflight],
        ).start()

    def _wait(t):
        # Only the transfer shape / semaphore matter for the wait descriptor;
        # every row copy is (1, d_pad), so row 0 stands in for the source.
        pltpu.make_async_copy(
            table_hbm.at[pl.ds(0, 1), :],
            out_ref.at[pl.ds(t, 1), :],
            sems.at[t % k_inflight],
        ).wait()

    def prime(t, carry):
        _issue(t)
        return carry

    lax.fori_loop(0, min(k_inflight, tm), prime, 0, unroll=True)

    def body(t, carry):
        _wait(t)

        @pl.when(t + k_inflight < tm)
        def _():
            _issue(t + k_inflight)

        return carry

    # The wait runs for every t in [0, tm): all outstanding DMAs are drained
    # before the body (and the pipeline's own output writeback) finishes.
    lax.fori_loop(0, tm, body, 0)


# ---------------------------------------------------------------------------
# Wrapper.
# ---------------------------------------------------------------------------

def token_embedding(ids, emb_table, *, mode="auto", max_block_tokens=1024,
                    onehot_max_vocab=2048):
    """emb_table[ids] * sqrt(d_model)  (TokenEmbedding.forward)."""
    vocab, d_model = emb_table.shape
    ids_shape = tuple(ids.shape)
    n = int(math.prod(ids_shape)) if ids_shape else 1
    itemsize = jnp.dtype(emb_table.dtype).itemsize
    scale = math.sqrt(d_model)

    # --- table prep: fold sqrt(d_model) in once, pad feature dim to lanes ----
    d_pad = _round_up(d_model, 128)
    table = (emb_table.astype(jnp.float32) * scale).astype(emb_table.dtype)
    if d_pad != d_model:
        table = jnp.pad(table, ((0, 0), (0, d_pad - d_model)))

    # Clamp ids (graceful handling of out-of-range tokens; nn.Embedding would
    # raise, here we clamp to keep DMAs in bounds).
    flat_ids = jnp.clip(ids.reshape(-1).astype(jnp.int32), 0, vocab - 1)

    # --- path + tile-size selection vs. the per-TensorCore VMEM budget -------
    cap = _vmem_capacity_bytes()
    budget = int(0.8 * cap)
    overhead = 2 << 20
    table_bytes = vocab * d_pad * itemsize
    out_tok = 2 * d_pad * itemsize                 # double-buffered output block
    fits_single = table_bytes + 8 * out_tok + overhead <= budget
    fits_double = 2 * table_bytes + 8 * out_tok + overhead <= budget

    if mode == "auto":
        if fits_single:
            mode = "onehot" if vocab <= onehot_max_vocab else "rowcopy"
        else:
            mode = "manual"

    per_tok = out_tok
    if mode == "onehot":
        per_tok += d_pad * 4 + vocab * 12          # f32 dot result + iota/one-hot
    if mode == "manual":
        avail = budget - overhead
    else:
        avail = budget - (2 if fits_double else 1) * table_bytes - overhead
    max_tm = min(max_block_tokens, max(8, avail // per_tok))
    tm = _pick_tm(n, max_tm)
    n_pad = _round_up(n, tm)
    num_blocks = n_pad // tm

    if n_pad != n:
        flat_ids = jnp.pad(flat_ids, (0, n_pad - n))

    out_shape = jax.ShapeDtypeStruct((n_pad, d_pad), table.dtype)
    out_spec = pl.BlockSpec((tm, d_pad), lambda i: (i, 0))
    out_bytes = n_pad * d_pad * itemsize
    ids_bytes = 4 * n_pad

    def _run_resident(single_buffer_table):
        if single_buffer_table:
            # Constant block index -> table DMA'd once; single buffer saves
            # table_bytes of VMEM (doubles the usable vocab on v7x's 64 MiB).
            table_spec = pl.BlockSpec((vocab, d_pad), lambda i: (0, 0),
                                      pipeline_mode=pl.Buffered(1))
            tbl_mult = 1
        else:
            table_spec = pl.BlockSpec((vocab, d_pad), lambda i: (0, 0))
            tbl_mult = 2
        need = tbl_mult * table_bytes + tm * per_tok + (4 << 20)
        if mode == "onehot":
            kernel = functools.partial(_onehot_gather_kernel, vocab=vocab)
            ids_arg = flat_ids.reshape(n_pad, 1)
            ids_spec = pl.BlockSpec((tm, 1), lambda i: (i, 0))
            flops = 2 * n_pad * vocab * d_pad
        else:
            kernel = functools.partial(_rowcopy_gather_kernel, tm=tm)
            ids_arg = flat_ids.reshape(num_blocks, tm)
            ids_spec = pl.BlockSpec((1, tm), lambda i: (i, 0),
                                    memory_space=pltpu.MemorySpace.SMEM)
            flops = n_pad * d_pad
        return pl.pallas_call(
            kernel,
            out_shape=out_shape,
            grid=(num_blocks,),
            in_specs=[ids_spec, table_spec],
            out_specs=out_spec,
            compiler_params=pltpu.CompilerParams(
                dimension_semantics=("parallel",),
                vmem_limit_bytes=int(min(cap, max(need, 32 << 20)))),
            cost_estimate=pl.CostEstimate(
                flops=int(flops), transcendentals=0,
                bytes_accessed=int(table_bytes + ids_bytes + out_bytes)),
        )(ids_arg, table)

    def _run_manual():
        k_inflight = min(32, tm)
        need = tm * per_tok + (4 << 20)
        kernel = functools.partial(_hbm_gather_kernel, tm=tm,
                                   k_inflight=k_inflight)
        return pl.pallas_call(
            kernel,
            out_shape=out_shape,
            grid=(num_blocks,),
            in_specs=[
                pl.BlockSpec((1, tm), lambda i: (i, 0),
                             memory_space=pltpu.MemorySpace.SMEM),
                pl.BlockSpec(memory_space=pl.ANY),        # table stays in HBM
            ],
            out_specs=out_spec,
            scratch_shapes=[pltpu.SemaphoreType.DMA((k_inflight,))],
            compiler_params=pltpu.CompilerParams(
                dimension_semantics=("parallel",),
                vmem_limit_bytes=int(min(cap, max(need, 32 << 20)))),
            cost_estimate=pl.CostEstimate(
                flops=int(n_pad * d_pad), transcendentals=0,
                bytes_accessed=int(n_pad * d_pad * itemsize + ids_bytes + out_bytes)),
        )(flat_ids.reshape(num_blocks, tm), table)

    if mode in ("onehot", "rowcopy"):
        if fits_double:
            out = _run_resident(single_buffer_table=False)
        else:
            try:
                out = _run_resident(single_buffer_table=True)
            except Exception:
                # pl.Buffered(1) not supported on this build -> HBM gather.
                out = _run_manual()
    else:
        out = _run_manual()

    if n_pad != n or d_pad != d_model:
        out = out[:n, :d_model]
    return out.reshape(*ids_shape, d_model)


if __name__ == "__main__":
    key = jax.random.PRNGKey(0)
    k_emb, k_ids, k_emb2, k_ids2 = jax.random.split(key, 4)

    # Small config matching the module's intent: vocab=64, d_model=32, (B,S)=(2,8).
    vocab_size, d_model = 64, 32
    batch, seq = 2, 8
    emb_table = jax.random.normal(k_emb, (vocab_size, d_model), dtype=jnp.float32)
    ids = jax.random.randint(k_ids, (batch, seq), 0, vocab_size, dtype=jnp.int32)
    ref = emb_table[ids] * math.sqrt(d_model)

    out = jax.block_until_ready(token_embedding(ids, emb_table))
    assert out.shape == (batch, seq, d_model)
    assert jnp.allclose(out, ref, atol=1e-5, rtol=1e-5), "auto (one-hot) mismatch"

    for m in ("rowcopy", "manual"):
        out_m = jax.block_until_ready(token_embedding(ids, emb_table, mode=m))
        assert jnp.allclose(out_m, ref, atol=1e-5, rtol=1e-5), f"{m} path mismatch"

    # Multi-block config: d_model already lane-aligned, token count not a
    # multiple of the block size (exercises token padding + multi-step grid).
    vocab2, d2, b2, s2 = 512, 256, 2, 301
    emb2 = jax.random.normal(k_emb2, (vocab2, d2), dtype=jnp.float32)
    ids2 = jax.random.randint(k_ids2, (b2, s2), 0, vocab2, dtype=jnp.int32)
    ref2 = emb2[ids2] * math.sqrt(d2)

    for m in ("auto", "rowcopy", "manual"):
        out2 = jax.block_until_ready(
            token_embedding(ids2, emb2, mode=m, max_block_tokens=128))
        assert out2.shape == (b2, s2, d2)
        assert jnp.allclose(out2, ref2, atol=1e-5, rtol=1e-5), f"{m} multi-block mismatch"

    print("KERNEL_OK")
</pallas_src>

<mosaic_0001>
module attributes {stable_mosaic.version = 11 : i64} {
  func.func @_onehot_gather_kernel(%arg0: i32, %arg1: memref<16x1xi32, #tpu.memory_space<vmem>>, %arg2: memref<64x128xf32, #tpu.memory_space<vmem>>, %arg3: memref<16x128xf32, #tpu.memory_space<vmem>>) attributes {dimension_semantics = [#tpu.dimension_semantics<parallel>], iteration_bounds = array<i64: 1>, scalar_prefetch = 0 : i64, scratch_operands = 0 : i64, tpu.core_type = #tpu.core_type<tc>, window_params = [{transform_indices = @transform_0, window_bounds = array<i64: 16, 1>}, {pipeline_mode = #tpu.pipeline_mode<synchronous>, transform_indices = @transform_1, window_bounds = array<i64: 64, 128>}, {transform_indices = @transform_2, window_bounds = array<i64: 16, 128>}]} {
    %c0 = arith.constant 0 : index
    %c0_0 = arith.constant 0 : index
    %0 = vector.load %arg1[%c0, %c0_0] : memref<16x1xi32, #tpu.memory_space<vmem>>, vector<16x1xi32>
    %1 = tpu.iota {dimensions = array<i32: 1>} : vector<16x64xi32>
    %2 = vector.broadcast %0 : vector<16x1xi32> to vector<16x64xi32>
    %3 = arith.cmpi eq, %2, %1 : vector<16x64xi32>
    %4 = arith.extui %3 : vector<16x64xi1> to vector<16x64xi32>
    %5 = arith.sitofp %4 : vector<16x64xi32> to vector<16x64xf32>
    %c0_1 = arith.constant 0 : index
    %c0_2 = arith.constant 0 : index
    %6 = vector.load %arg2[%c0_1, %c0_2] : memref<64x128xf32, #tpu.memory_space<vmem>>, vector<64x128xf32>
    %cst = arith.constant dense<0.000000e+00> : vector<16x128xf32>
    %7 = tpu.matmul %5, %6, %cst {dimension_numbers = #tpu.dot_dimension_numbers<[1], [0], [0], [1], [0, 0, 1, 1], [], []>} : vector<16x64xf32>, vector<64x128xf32>, vector<16x128xf32> -> vector<16x128xf32>
    %c0_3 = arith.constant 0 : index
    %c0_4 = arith.constant 0 : index
    %8 = vector.load %arg3[%c0_3, %c0_4] : memref<16x128xf32, #tpu.memory_space<vmem>>, vector<16x128xf32>
    tpu.vector_store %arg3[%c0_3, %c0_4], %7 {strides = array<i32>} : memref<16x128xf32, #tpu.memory_space<vmem>>, vector<16x128xf32>,
    return
  }
  func.func @transform_0(%arg0: i32) -> (i32, i32) {
    %c0_i32 = arith.constant 0 : i32
    %c0_i32_0 = arith.constant 0 : i32
    return %arg0, %c0_i32 : i32, i32
  }
  func.func @transform_1(%arg0: i32) -> (i32, i32) {
    %c0_i32 = arith.constant 0 : i32
    %c0_i32_0 = arith.constant 0 : i32
    %c0_i32_1 = arith.constant 0 : i32
    return %c0_i32, %c0_i32_0 : i32, i32
  }
  func.func @transform_2(%arg0: i32) -> (i32, i32) {
    %c0_i32 = arith.constant 0 : i32
    %c0_i32_0 = arith.constant 0 : i32
    return %arg0, %c0_i32 : i32, i32
  }
}

</mosaic_0001>

<bundles_post_ra>
// kernel: tpu_custom_call.1
= control target key start
LH: loop header
LB: loop body
LE: loop exit
PB: predicated region body
PF: predicated region fallthrough
CT: control target
= control target key end

     0   :  { %7 = vsyncpa [#allocation3], 0  ;;  %s312_s0 = inlined_call_operand.vmem [shape: s32[16,1], index: 0, kind: input, shape index: {}]   ;;  %s313_s1 = inlined_call_operand.hbm [shape: f32[64,128], index: 1, kind: input, shape index: {}]   ;;  %s314_s2 = inlined_call_operand.hbm [shape: f32[16,128], index: 2, kind: output, shape index: {}]  }
   0x1   :  { %8 = vsyncpa [#allocation4], 0  ;;  %s255_s9 = smov [#allocation2]   ;;  %s207_s13 = scalar_lea.hbm %s313_s1, 1024 }
   0x2   :  { %s16_s10 = sshll.u32 %s255_s9, 4  ;;  %p208_p0 = scmp.ne.s32.totalorder %s313_s1, %s207_s13  ;;  %s17_s10 = int_to_ptr.vmem [resolvable:$true] %s16_s10 }
   0x3   :  { %p211_p1 = scmp.lt.u32.totalorder %s207_s13, %s313_s1 }
   0x5   :  { %p213_p2 = pnand %p211_p1, %p208_p0 }
   0x7   :  { %216 = shalt.err (!%p213_p2)
}
   0x8   :  { %s217_s18 = scalar_lea.vmem %s17_s10, 1024  ;;  %p222_p4 = scmp.lt.s32.totalorder %s17_s10, %s17_s10 }
   0x9   :  { %p218_p3 = scmp.ne.s32.totalorder %s17_s10, %s217_s18  ;;  %p223_p5 = scmp.lt.s32.totalorder %s217_s18, %s217_s18 }
   0xb   :  { %p224_p6 = por %p223_p5, %p222_p4 }
   0xd   :  { %p225_p7 = pnand %p224_p6, %p218_p3 }
   0xf   :  { %228 = shalt.err (!%p225_p7)
}
  0x10   :  { %s256_s19 = smov 128   ;;  %s257_s20 = smov 8  }
  0x11   :  { %22 = dma.hbm_to_vmem [thread:$0]  %s313_s1, 1024, %s17_s10, [#allocation3], %s256_s19, %s256_s19, %s257_s20  }
  0x12   :  { %251 = dma.done.wait [#allocation3], 1024  }
  0x13   :  { %252 = vsyncadd [#allocation3], 4294966272  ;;  %v258_v0 = vmov 0   ;;  %v26_v1 = vld [vmem:[%s312_s0] sm:$0xff]  ;;  %v43_v3 = vld [vmem:[#allocation2 + $0x8] sm:$0xff]  ;;  %v28_v15 = vlaneseq  ;;  %vm50_vm0 = vcmask 523264  }
  0x14   :  { %206 = vset.pattern.permute.xlu0 %v258_v0  ;;  %v42_v2 = vld [vmem:[#allocation2] sm:$0xff]  ;;  %v44_v4 = vld [vmem:[#allocation2 + $0x10] sm:$0xff]  ;;  %v45_v5 = vld [vmem:[#allocation2 + $0x18] sm:$0xff]  ;;  %v259_v18 = vmov 0.0  }
  0x15   :  { %31 = vperm.xlu0 %206, %v26_v1   ;;  %v27_v6 = vld [vmem:[%s312_s0 + $0x8] sm:$0xff]  ;;  %v184_v7 = vpack.c.bf16 %v43_v3, %v42_v2  ;;  %v188_v8 = vpack.c.bf16 %v45_v5, %v44_v4  ;;  %v46_v9 = vld [vmem:[#allocation2 + $0x20] sm:$0xff]  ;;  %v48_v12 = vld [vmem:[#allocation2 + $0x30] sm:$0xff]  ;;  %v29_v16 = vand.u32 127, %v28_v15  ;;  %s260_s0 = smov [#allocation5]  }
  0x16   :  { %v47_v10 = vld [vmem:[#allocation2 + $0x28] sm:$0xff]  ;;  %v49_v13 = vld [vmem:[#allocation2 + $0x38] sm:$0xff]  ;;  %s139_s1 = sshll.u32 %s260_s0, 4  ;;  %s140_s1 = int_to_ptr.vmem [resolvable:$true] %s139_s1 }
  0x17   :  { %185 = vmatprep.subr.bf16.mxu0 %v184_v7  ;;  %v192_v11 = vpack.c.bf16 %v47_v10, %v46_v9  ;;  %v196_v14 = vpack.c.bf16 %v49_v13, %v48_v12  ;;  %s229_s27 = scalar_lea.vmem %s140_s1, 256  ;;  %p234_p9 = scmp.lt.s32.totalorder %s140_s1, %s140_s1 }
  0x18   :  { %187 = vmatpush3.bf16.msra.mxu0 %v184_v7  ;;  %p230_p8 = scmp.ne.s32.totalorder %s140_s1, %s229_s27  ;;  %p235_p10 = scmp.lt.s32.totalorder %s229_s27, %s229_s27 }
  0x19   :  { %34 = vperm.xlu0 %206, %v27_v6   ;;  %189 = vmatprep.subr.bf16.mxu0 %v188_v8 }
  0x1a   :  { %p236_p11 = por %p235_p10, %p234_p9 }
  0x1c   :  { %191 = vmatpush3.bf16.msra.mxu0 %v188_v8  ;;  %p237_p12 = pnand %p236_p11, %p230_p8 }
  0x1d   :  { %193 = vmatprep.subr.bf16.mxu0 %v192_v11 }
  0x20   :  { %195 = vmatpush3.bf16.msra.mxu0 %v192_v11 }
  0x21   :  { %197 = vmatprep.subr.bf16.mxu0 %v196_v14 }
  0x24   :  { %199 = vmatpush3.bf16.msra.mxu0 %v196_v14 }
  0x94   :  { %v32_v17 = vpop.permute.xlu0 %31 }
  0x95   :  { %vm36_vm1 = vcmp.eq.s32.totalorder %v32_v17, %v29_v16 }
  0x96   :  { %v151_v19 = vsel %vm36_vm1, 1.0, %v259_v18 }
  0x97   :  { %181 = vmatprep.mubr.msk.f32.mxu0 %vm50_vm0, %v151_v19 }
  0x98   :  { %v35_v20 = vpop.permute.xlu0 %34 }
  0x99   :  { %vm37_vm2 = vcmp.eq.s32.totalorder %v35_v20, %v29_v16 }
  0x9a   :  { %v152_v21 = vsel %vm37_vm2, 1.0, %v259_v18 }
  0x9b   :  { %182 = vmatmul.mubr.msk.f32.vlgmr.msra.gmra.mrb[0].mxu0 %vm50_vm0, %v152_v21 }
 0x16e   :  { %v183_v22 = vpop.f32.mrb[0].mxu0 }
 0x16f   :  { %133 = vst [vmem:[#allocation5 + $0x8] sm:$0xff] %v183_v22  ;;  %v123_v23 = vpop.f32.mrb[1].mxu0 }
 0x170   :  { %132 = vst [vmem:[#allocation5] sm:$0xff] %v123_v23 }
 0x171   :  { %240 = shalt.err (!%p237_p12)
}
 0x172   :  { %s241_s30 = scalar_lea.hbm %s314_s2, 256 }
 0x173   :  { %p242_p13 = scmp.ne.s32.totalorder %s314_s2, %s241_s30  ;;  %p245_p0 = scmp.lt.u32.totalorder %s241_s30, %s314_s2 }
 0x175   :  { %p247_p1 = pnand %p245_p0, %p242_p13 }
 0x177   :  { %250 = shalt.err (!%p247_p1)
}
 0x178   :  { %145 = dma.vmem_to_hbm [thread:$0]  %s140_s1, 256, %s314_s2, [#allocation4], %s256_s19, %s256_s19, %s257_s20  }
 0x179   :  { %253 = dma.done.wait [#allocation4], 256  }
 0x17a   :  { %254 = vsyncadd [#allocation4], 4294967040 }
 0x17b   :  { %149 = vsyncpa [#allocation3], 1 }
 0x17c   :  { %150 = vsyncpa [#allocation4], 1 }

</bundles_post_ra>
